<compile_context>
chip_gen: v7x
topology: tpu7x:2x2x1
jax: 0.10.0
libtpu: 0.0.40
codegen_flags: <defaults>
</compile_context>

<pallas_src>
import functools
import math

import jax
import jax.numpy as jnp
from jax.experimental import pallas as pl
from jax.experimental.pallas import tpu as pltpu


def _round_up(x, m):
    return (x + m - 1) // m * m


def _dual_attention_kernel(vision_ref, vocal_ref, wf_ref, wm_ref, wh_ref,
                           bf_ref, bm_ref, bh_ref, out_ref,
                           m_sc, visk_sc, logits_sc, *, tv, ta):
    """Fused, weight-streaming DualAttention forward.

    Grid = (4, n_tiles):
      phase p: 0 = round-1 vision, 1 = round-1 vocal, 2 = round-2 vision, 3 = round-2 vocal
      j      : streams tile_n output columns of W_f / W_m and tile_n contraction rows of W_h.

    Per-step refs:
      vision_ref/vocal_ref : (Tp, N)      f32, zero-padded rows, resident (constant index)
      wf_ref / wm_ref      : (N, tile_n)  bf16 feature / memory-projection weight tiles
      wh_ref               : (tile_n, N)  bf16 attention-logit weight tile (contraction split)
      bf_ref / bm_ref      : (1, tile_n)  f32
      bh_ref               : (1, N)       f32
      out_ref              : (1, N)       f32  -> m_two
    Scratch:
      m_sc (1, N) running memory, visk_sc (1, N) vision_k stash, logits_sc (Tp, N) accumulator.
    """
    p = pl.program_id(0)
    j = pl.program_id(1)
    nj = pl.num_programs(1)
    last_p = pl.num_programs(0) - 1
    is_vision = (p % 2) == 0

    # ---- m0 = mean(vision) * mean(vocal), once at the very first grid step ----
    @pl.when((p == 0) & (j == 0))
    def _():
        m_sc[...] = (jnp.sum(vision_ref[...], axis=0, keepdims=True) * (1.0 / tv)) * \
                    (jnp.sum(vocal_ref[...], axis=0, keepdims=True) * (1.0 / ta))

    # ---- zero the logits accumulator at the start of every phase ----
    @pl.when(j == 0)
    def _():
        logits_sc[...] = jnp.zeros_like(logits_sc)

    x = jnp.where(is_vision, vision_ref[...], vocal_ref[...])          # (Tp, N) f32
    m = m_sc[...]                                                      # (1, N)  f32

    # ---- streamed tile:  h_tile = tanh(x @ Wf) * tanh(m @ Wm);  logits += h_tile @ Wh ----
    feat = jnp.tanh(
        jnp.dot(x.astype(jnp.bfloat16), wf_ref[...],
                preferred_element_type=jnp.float32) + bf_ref[...])     # (Tp, tile_n) f32
    mproj = jnp.tanh(
        jnp.dot(m.astype(jnp.bfloat16), wm_ref[...],
                preferred_element_type=jnp.float32) + bm_ref[...])     # (1, tile_n)  f32
    h = feat * mproj                                                   # (Tp, tile_n) f32
    logits_sc[...] += jnp.dot(h.astype(jnp.bfloat16), wh_ref[...],
                              preferred_element_type=jnp.float32)      # (Tp, N) f32

    # ---- phase finalize: softmax, attention-weighted mean, memory update ----
    @pl.when(j == nj - 1)
    def _():
        logits = logits_sc[...] + bh_ref[...]
        z = logits - jnp.max(logits, axis=-1, keepdims=True)
        e = jnp.exp(z)
        a = e * pl.reciprocal(jnp.sum(e, axis=-1, keepdims=True), approx=True)
        inv_count = jnp.where(is_vision, jnp.float32(1.0 / tv), jnp.float32(1.0 / ta))
        # padded rows of x are exactly zero -> they contribute nothing to the sum
        out_k = jnp.sum(a * x, axis=0, keepdims=True) * inv_count      # (1, N)

        @pl.when(is_vision)
        def _():
            visk_sc[...] = out_k

        @pl.when(jnp.logical_not(is_vision))
        def _():
            m_sc[...] = m_sc[...] + visk_sc[...] * out_k

    @pl.when((p == last_p) & (j == nj - 1))
    def _():
        out_ref[...] = m_sc[...]


def dual_attention_forward(vocal, vision, kernel_params, *, tile_n=512):
    """vocal: (Ta, N), vision: (Tv, N) -> m_two: (1, N), like DualAttention.forward."""
    wf, wm, wh, bf, bm, bh = kernel_params
    Ta, N = vocal.shape
    Tv, _ = vision.shape
    tile_n = min(tile_n, N)
    assert N % 128 == 0, "hidden size must be a multiple of 128 (lane alignment)"
    assert tile_n % 128 == 0 and N % tile_n == 0
    n_tiles = N // tile_n

    # Pad both modalities to a common row count that is a multiple of 8 (f32 sublane tile).
    tp = max(_round_up(Tv, 8), _round_up(Ta, 8))
    vision_p = jnp.zeros((tp, N), jnp.float32).at[:Tv, :].set(vision.astype(jnp.float32))
    vocal_p = jnp.zeros((tp, N), jnp.float32).at[:Ta, :].set(vocal.astype(jnp.float32))

    # Explicit VMEM budget: double-buffered bf16 weight tiles + resident activations + scratch.
    w_tile_bytes = (2 * N * tile_n + tile_n * N) * 2          # Wf + Wm + Wh tiles, bf16
    vmem_limit = int(2 * w_tile_bytes                         # pipeline double-buffering
                     + 2 * tp * N * 4                         # resident vision / vocal
                     + (2 * N + tp * N) * 4                   # m / vis_k / logits scratch
                     + (16 << 20))                            # headroom

    kernel = functools.partial(_dual_attention_kernel, tv=Tv, ta=Ta)
    grid_spec = pltpu.PrefetchScalarGridSpec(
        num_scalar_prefetch=0,
        grid=(4, n_tiles),
        in_specs=[
            pl.BlockSpec((tp, N), lambda p, j: (0, 0)),               # vision (resident)
            pl.BlockSpec((tp, N), lambda p, j: (0, 0)),               # vocal  (resident)
            pl.BlockSpec((None, N, tile_n), lambda p, j: (p, 0, j)),  # W_f tile  (bf16)
            pl.BlockSpec((None, N, tile_n), lambda p, j: (p, 0, j)),  # W_m tile  (bf16)
            pl.BlockSpec((None, tile_n, N), lambda p, j: (p, j, 0)),  # W_h tile  (bf16)
            pl.BlockSpec((None, 1, tile_n), lambda p, j: (p, 0, j)),  # b_f tile
            pl.BlockSpec((None, 1, tile_n), lambda p, j: (p, 0, j)),  # b_m tile
            pl.BlockSpec((None, 1, N), lambda p, j: (p, 0, 0)),       # b_h (full row)
        ],
        out_specs=pl.BlockSpec((1, N), lambda p, j: (0, 0)),
        scratch_shapes=[
            pltpu.VMEM((1, N), jnp.float32),    # m (running memory vector)
            pltpu.VMEM((1, N), jnp.float32),    # vision_k stash
            pltpu.VMEM((tp, N), jnp.float32),   # logits accumulator
        ],
    )
    return pl.pallas_call(
        kernel,
        out_shape=jax.ShapeDtypeStruct((1, N), jnp.float32),
        grid_spec=grid_spec,
        compiler_params=pltpu.CompilerParams(
            dimension_semantics=("arbitrary", "arbitrary"),
            vmem_limit_bytes=vmem_limit,
        ),
    )(vision_p, vocal_p, wf, wm, wh, bf, bm, bh)


def init_dual_attention_params(key, hidden_size):
    """12 nn.Linear(N, N)-style f32 params, PyTorch layout (out,in) & init.

    Order: [Wvision_1, Wvision_m1, Wvision_h1, Wvocal_1, Wvocal_m1, Wvocal_h1,
            Wvision_2, Wvision_m2, Wvision_h2, Wvocal_2, Wvocal_m2, Wvocal_h2]
    """
    N = hidden_size
    bound = 1.0 / math.sqrt(N)
    keys = jax.random.split(key, 24)
    params = []
    for i in range(12):
        w = jax.random.uniform(keys[2 * i], (N, N), minval=-bound, maxval=bound,
                               dtype=jnp.float32)
        b = jax.random.uniform(keys[2 * i + 1], (N,), minval=-bound, maxval=bound,
                               dtype=jnp.float32)
        params.append((w, b))
    return params


def pack_params_for_kernel(params):
    """Pre-transpose, phase-order and cast weights to bf16 ONCE (not per forward).

    Phase order p=0..3: round-1 vision, round-1 vocal, round-2 vision, round-2 vocal.
    Returns (wf, wm, wh) as (4, N, N) bf16 stored as W.T (so y = x @ W[p] + b[p]) and
    (bf, bm, bh) as (4, 1, N) f32.
    """
    N = params[0][0].shape[0]
    phase_idx = [(0, 1, 2), (3, 4, 5), (6, 7, 8), (9, 10, 11)]

    def stack(which, cast_bf16):
        w = jnp.stack([params[phase_idx[p][which]][0].T for p in range(4)])
        b = jnp.stack([params[phase_idx[p][which]][1].reshape(1, N) for p in range(4)])
        return (w.astype(jnp.bfloat16) if cast_bf16 else w), b

    wf, bf = stack(0, True)
    wm, bm = stack(1, True)
    wh, bh = stack(2, True)
    return wf, wm, wh, bf, bm, bh


def dual_attention_ref(vocal, vision, params):
    """Pure-JAX f32 reference mirroring the PyTorch forward (correctness check)."""
    def lin(x, i):
        w, b = params[i]
        return x @ w.T + b

    def softmax(z):
        z = z - jnp.max(z, axis=-1, keepdims=True)
        e = jnp.exp(z)
        return e / jnp.sum(e, axis=-1, keepdims=True)

    m = jnp.mean(vision, axis=0, keepdims=True) * jnp.mean(vocal, axis=0, keepdims=True)
    for r in range(2):
        vb, ab = 6 * r, 6 * r + 3
        h_vis = jnp.tanh(lin(vision, vb)) * jnp.tanh(lin(m, vb + 1))
        a_vis = softmax(lin(h_vis, vb + 2))
        vis_k = jnp.mean(a_vis * vision, axis=0, keepdims=True)
        h_voc = jnp.tanh(lin(vocal, ab)) * jnp.tanh(lin(m, ab + 1))
        a_voc = softmax(lin(h_voc, ab + 2))
        voc_k = jnp.mean(a_voc * vocal, axis=0, keepdims=True)
        m = m + vis_k * voc_k
    return m


if __name__ == "__main__":
    # Small stand-in for dan_hidden_size=2048: N a multiple of 128, tile_n=128 so the
    # weight-streaming grid path (n_tiles > 1) is actually exercised at this tiny size.
    N = 256
    Tv, Ta = 8, 16

    key = jax.random.PRNGKey(0)
    kvis, kvoc, kp = jax.random.split(key, 3)
    vision = jax.random.normal(kvis, (Tv, N), dtype=jnp.float32)
    vocal = jax.random.normal(kvoc, (Ta, N), dtype=jnp.float32)

    params = init_dual_attention_params(kp, N)
    kernel_params = pack_params_for_kernel(params)

    out = dual_attention_forward(vocal, vision, kernel_params, tile_n=128)
    out = jax.block_until_ready(out)
    assert out.shape == (1, N)

    ref = dual_attention_ref(vocal, vision, params)
    max_err = float(jnp.max(jnp.abs(out - ref)))
    assert max_err < 5e-3, f"max abs err {max_err}"

    print("KERNEL_OK")
</pallas_src>

<mosaic_0001>
module attributes {stable_mosaic.version = 11 : i64} {
  func.func @_dual_attention_kernel(%arg0: i32, %arg1: i32, %arg2: memref<16x256xf32, #tpu.memory_space<vmem>>, %arg3: memref<16x256xf32, #tpu.memory_space<vmem>>, %arg4: memref<1x256x128xbf16, #tpu.memory_space<vmem>>, %arg5: memref<1x256x128xbf16, #tpu.memory_space<vmem>>, %arg6: memref<1x128x256xbf16, #tpu.memory_space<vmem>>, %arg7: memref<1x1x128xf32, #tpu.memory_space<vmem>>, %arg8: memref<1x1x128xf32, #tpu.memory_space<vmem>>, %arg9: memref<1x1x256xf32, #tpu.memory_space<vmem>>, %arg10: memref<1x256xf32, #tpu.memory_space<vmem>>, %arg11: memref<1x256xf32, #tpu.memory_space<vmem>>, %arg12: memref<1x256xf32, #tpu.memory_space<vmem>>, %arg13: memref<16x256xf32, #tpu.memory_space<vmem>>) attributes {dimension_semantics = [#tpu.dimension_semantics<arbitrary>, #tpu.dimension_semantics<arbitrary>], iteration_bounds = array<i64: 4, 2>, scalar_prefetch = 0 : i64, scratch_operands = 3 : i64, tpu.core_type = #tpu.core_type<tc>, window_params = [{pipeline_mode = #tpu.pipeline_mode<synchronous>, transform_indices = @transform_0, window_bounds = array<i64: 16, 256>}, {pipeline_mode = #tpu.pipeline_mode<synchronous>, transform_indices = @transform_1, window_bounds = array<i64: 16, 256>}, {transform_indices = @transform_2, window_bounds = array<i64: 1, 256, 128>}, {transform_indices = @transform_3, window_bounds = array<i64: 1, 256, 128>}, {transform_indices = @transform_4, window_bounds = array<i64: 1, 128, 256>}, {transform_indices = @transform_5, window_bounds = array<i64: 1, 1, 128>}, {transform_indices = @transform_6, window_bounds = array<i64: 1, 1, 128>}, {transform_indices = @transform_7, window_bounds = array<i64: 1, 1, 256>}, {pipeline_mode = #tpu.pipeline_mode<synchronous>, transform_indices = @transform_8, window_bounds = array<i64: 1, 256>}]} {
    %c2_i32 = arith.constant 2 : i32
    %c0_i32 = arith.constant 0 : i32
    %0 = arith.cmpi eq, %c2_i32, %c0_i32 : i32
    %c1_i32 = arith.constant 1 : i32
    %1 = arith.select %0, %c1_i32, %c2_i32 : i32
    %2 = arith.remsi %arg0, %1 : i32
    %c0_i32_0 = arith.constant 0 : i32
    %3 = arith.cmpi ne, %2, %c0_i32_0 : i32
    %c0_i32_1 = arith.constant 0 : i32
    %4 = arith.cmpi slt, %2, %c0_i32_1 : i32
    %c0_i32_2 = arith.constant 0 : i32
    %5 = arith.cmpi slt, %1, %c0_i32_2 : i32
    %6 = arith.xori %4, %5 : i1
    %7 = arith.andi %6, %3 : i1
    %8 = arith.addi %2, %1 : i32
    %9 = arith.select %7, %8, %2 : i32
    %c0_i32_3 = arith.constant 0 : i32
    %10 = arith.cmpi eq, %9, %c0_i32_3 : i32
    %c0_i32_4 = arith.constant 0 : i32
    %11 = arith.cmpi eq, %arg0, %c0_i32_4 : i32
    %c0_i32_5 = arith.constant 0 : i32
    %12 = arith.cmpi eq, %arg1, %c0_i32_5 : i32
    %13 = arith.andi %11, %12 : i1
    %14 = arith.extui %13 : i1 to i32
    %c0_i32_6 = arith.constant 0 : i32
    %15 = arith.cmpi ne, %14, %c0_i32_6 : i32
    scf.if %15 {
      %c0_39 = arith.constant 0 : index
      %c0_40 = arith.constant 0 : index
      %57 = vector.load %arg2[%c0_39, %c0_40] : memref<16x256xf32, #tpu.memory_space<vmem>>, vector<16x256xf32>
      %cst_41 = arith.constant dense<0.000000e+00> : vector<256xf32>
      %58 = vector.multi_reduction <add>, %57, %cst_41 [0] : vector<16x256xf32> to vector<256xf32>
      %59 = vector.shape_cast %58 : vector<256xf32> to vector<1x256xf32>
      %cst_42 = arith.constant 1.250000e-01 : f32
      %60 = vector.broadcast %cst_42 : f32 to vector<1x256xf32>
      %61 = arith.mulf %59, %60 : vector<1x256xf32>
      %c0_43 = arith.constant 0 : index
      %c0_44 = arith.constant 0 : index
      %62 = vector.load %arg3[%c0_43, %c0_44] : memref<16x256xf32, #tpu.memory_space<vmem>>, vector<16x256xf32>
      %cst_45 = arith.constant dense<0.000000e+00> : vector<256xf32>
      %63 = vector.multi_reduction <add>, %62, %cst_45 [0] : vector<16x256xf32> to vector<256xf32>
      %64 = vector.shape_cast %63 : vector<256xf32> to vector<1x256xf32>
      %cst_46 = arith.constant 6.250000e-02 : f32
      %65 = vector.broadcast %cst_46 : f32 to vector<1x256xf32>
      %66 = arith.mulf %64, %65 : vector<1x256xf32>
      %67 = arith.mulf %61, %66 : vector<1x256xf32>
      %c0_47 = arith.constant 0 : index
      %c0_48 = arith.constant 0 : index
      %68 = vector.load %arg11[%c0_47, %c0_48] : memref<1x256xf32, #tpu.memory_space<vmem>>, vector<1x256xf32>
      tpu.vector_store %arg11[%c0_47, %c0_48], %67 {strides = array<i32>} : memref<1x256xf32, #tpu.memory_space<vmem>>, vector<1x256xf32>,
    } else {
    }
    %c0_i32_7 = arith.constant 0 : i32
    %16 = arith.cmpi eq, %arg1, %c0_i32_7 : i32
    %17 = arith.extui %16 : i1 to i32
    %c0_i32_8 = arith.constant 0 : i32
    %18 = arith.cmpi ne, %17, %c0_i32_8 : i32
    scf.if %18 {
      %cst_39 = arith.constant 0.000000e+00 : f32
      %57 = vector.broadcast %cst_39 : f32 to vector<16x256xf32>
      %c0_40 = arith.constant 0 : index
      %c0_41 = arith.constant 0 : index
      %58 = vector.load %arg13[%c0_40, %c0_41] : memref<16x256xf32, #tpu.memory_space<vmem>>, vector<16x256xf32>
      tpu.vector_store %arg13[%c0_40, %c0_41], %57 {strides = array<i32>} : memref<16x256xf32, #tpu.memory_space<vmem>>, vector<16x256xf32>,
    } else {
    }
    %c0 = arith.constant 0 : index
    %c0_9 = arith.constant 0 : index
    %19 = vector.load %arg2[%c0, %c0_9] : memref<16x256xf32, #tpu.memory_space<vmem>>, vector<16x256xf32>
    %c0_10 = arith.constant 0 : index
    %c0_11 = arith.constant 0 : index
    %20 = vector.load %arg3[%c0_10, %c0_11] : memref<16x256xf32, #tpu.memory_space<vmem>>, vector<16x256xf32>
    %21 = arith.select %10, %19, %20 : vector<16x256xf32>
    %c0_12 = arith.constant 0 : index
    %c0_13 = arith.constant 0 : index
    %22 = vector.load %arg11[%c0_12, %c0_13] : memref<1x256xf32, #tpu.memory_space<vmem>>, vector<1x256xf32>
    %23 = arith.truncf %21 : vector<16x256xf32> to vector<16x256xbf16>
    %c0_14 = arith.constant 0 : index
    %c0_15 = arith.constant 0 : index
    %c0_16 = arith.constant 0 : index
    %24 = vector.load %arg4[%c0_14, %c0_15, %c0_16] : memref<1x256x128xbf16, #tpu.memory_space<vmem>>, vector<1x256x128xbf16>
    %25 = vector.shape_cast %24 : vector<1x256x128xbf16> to vector<256x128xbf16>
    %cst = arith.constant dense<0.000000e+00> : vector<16x128xf32>
    %26 = tpu.matmul %23, %25, %cst {dimension_numbers = #tpu.dot_dimension_numbers<[1], [0], [0], [1], [0, 0, 1, 1], [], []>} : vector<16x256xbf16>, vector<256x128xbf16>, vector<16x128xf32> -> vector<16x128xf32>
    %c0_17 = arith.constant 0 : index
    %c0_18 = arith.constant 0 : index
    %c0_19 = arith.constant 0 : index
    %27 = vector.load %arg7[%c0_17, %c0_18, %c0_19] : memref<1x1x128xf32, #tpu.memory_space<vmem>>, vector<1x1x128xf32>
    %28 = vector.shape_cast %27 : vector<1x1x128xf32> to vector<1x128xf32>
    %29 = vector.broadcast %28 : vector<1x128xf32> to vector<16x128xf32>
    %30 = arith.addf %26, %29 : vector<16x128xf32>
    %31 = math.tanh %30 : vector<16x128xf32>
    %32 = arith.truncf %22 : vector<1x256xf32> to vector<1x256xbf16>
    %c0_20 = arith.constant 0 : index
    %c0_21 = arith.constant 0 : index
    %c0_22 = arith.constant 0 : index
    %33 = vector.load %arg5[%c0_20, %c0_21, %c0_22] : memref<1x256x128xbf16, #tpu.memory_space<vmem>>, vector<1x256x128xbf16>
    %34 = vector.shape_cast %33 : vector<1x256x128xbf16> to vector<256x128xbf16>
    %cst_23 = arith.constant dense<0.000000e+00> : vector<1x128xf32>
    %35 = tpu.matmul %32, %34, %cst_23 {dimension_numbers = #tpu.dot_dimension_numbers<[1], [0], [0], [1], [0, 0, 1, 1], [], []>} : vector<1x256xbf16>, vector<256x128xbf16>, vector<1x128xf32> -> vector<1x128xf32>
    %c0_24 = arith.constant 0 : index
    %c0_25 = arith.constant 0 : index
    %c0_26 = arith.constant 0 : index
    %36 = vector.load %arg8[%c0_24, %c0_25, %c0_26] : memref<1x1x128xf32, #tpu.memory_space<vmem>>, vector<1x1x128xf32>
    %37 = vector.shape_cast %36 : vector<1x1x128xf32> to vector<1x128xf32>
    %38 = arith.addf %35, %37 : vector<1x128xf32>
    %39 = math.tanh %38 : vector<1x128xf32>
    %40 = vector.broadcast %39 : vector<1x128xf32> to vector<16x128xf32>
    %41 = arith.mulf %31, %40 : vector<16x128xf32>
    %c0_27 = arith.constant 0 : index
    %c0_28 = arith.constant 0 : index
    %42 = vector.load %arg13[%c0_27, %c0_28] : memref<16x256xf32, #tpu.memory_space<vmem>>, vector<16x256xf32>
    %43 = arith.truncf %41 : vector<16x128xf32> to vector<16x128xbf16>
    %c0_29 = arith.constant 0 : index
    %c0_30 = arith.constant 0 : index
    %c0_31 = arith.constant 0 : index
    %44 = vector.load %arg6[%c0_29, %c0_30, %c0_31] : memref<1x128x256xbf16, #tpu.memory_space<vmem>>, vector<1x128x256xbf16>
    %45 = vector.shape_cast %44 : vector<1x128x256xbf16> to vector<128x256xbf16>
    %cst_32 = arith.constant dense<0.000000e+00> : vector<16x256xf32>
    %46 = tpu.matmul %43, %45, %cst_32 {dimension_numbers = #tpu.dot_dimension_numbers<[1], [0], [0], [1], [0, 0, 1, 1], [], []>} : vector<16x128xbf16>, vector<128x256xbf16>, vector<16x256xf32> -> vector<16x256xf32>
    %47 = arith.addf %42, %46 : vector<16x256xf32>
    %c0_33 = arith.constant 0 : index
    %c0_34 = arith.constant 0 : index
    %48 = vector.load %arg13[%c0_33, %c0_34] : memref<16x256xf32, #tpu.memory_space<vmem>>, vector<16x256xf32>
    tpu.vector_store %arg13[%c0_33, %c0_34], %47 {strides = array<i32>} : memref<16x256xf32, #tpu.memory_space<vmem>>, vector<16x256xf32>,
    %c1_i32_35 = arith.constant 1 : i32
    %49 = arith.cmpi eq, %arg1, %c1_i32_35 : i32
    %50 = arith.extui %49 : i1 to i32
    %c0_i32_36 = arith.constant 0 : i32
    %51 = arith.cmpi ne, %50, %c0_i32_36 : i32
    scf.if %51 {
      %c0_39 = arith.constant 0 : index
      %c0_40 = arith.constant 0 : index
      %57 = vector.load %arg13[%c0_39, %c0_40] : memref<16x256xf32, #tpu.memory_space<vmem>>, vector<16x256xf32>
      %c0_41 = arith.constant 0 : index
      %c0_42 = arith.constant 0 : index
      %c0_43 = arith.constant 0 : index
      %58 = vector.load %arg9[%c0_41, %c0_42, %c0_43] : memref<1x1x256xf32, #tpu.memory_space<vmem>>, vector<1x1x256xf32>
      %59 = vector.shape_cast %58 : vector<1x1x256xf32> to vector<1x256xf32>
      %60 = vector.broadcast %59 : vector<1x256xf32> to vector<16x256xf32>
      %61 = arith.addf %57, %60 : vector<16x256xf32>
      %cst_44 = arith.constant dense<0xFF800000> : vector<16xf32>
      %62 = vector.multi_reduction <maximumf>, %61, %cst_44 [1] : vector<16x256xf32> to vector<16xf32>
      %63 = vector.shape_cast %62 : vector<16xf32> to vector<16x1xf32>
      %64 = vector.broadcast %63 : vector<16x1xf32> to vector<16x256xf32>
      %65 = arith.subf %61, %64 : vector<16x256xf32>
      %66 = math.exp %65 : vector<16x256xf32>
      %cst_45 = arith.constant dense<0.000000e+00> : vector<16xf32>
      %67 = vector.multi_reduction <add>, %66, %cst_45 [1] : vector<16x256xf32> to vector<16xf32>
      %68 = vector.shape_cast %67 : vector<16xf32> to vector<16x1xf32>
      %69 = tpu.reciprocal %68 {approx = true} : vector<16x1xf32> -> vector<16x1xf32>
      %70 = vector.broadcast %69 : vector<16x1xf32> to vector<16x256xf32>
      %71 = arith.mulf %66, %70 : vector<16x256xf32>
      %cst_46 = arith.constant 1.250000e-01 : f32
      %cst_47 = arith.constant 6.250000e-02 : f32
      %72 = arith.select %10, %cst_46, %cst_47 : f32
      %73 = arith.mulf %71, %21 : vector<16x256xf32>
      %cst_48 = arith.constant dense<0.000000e+00> : vector<256xf32>
      %74 = vector.multi_reduction <add>, %73, %cst_48 [0] : vector<16x256xf32> to vector<256xf32>
      %75 = vector.shape_cast %74 : vector<256xf32> to vector<1x256xf32>
      %76 = vector.broadcast %72 : f32 to vector<1x256xf32>
      %77 = arith.mulf %75, %76 : vector<1x256xf32>
      %78 = arith.extui %10 : i1 to i32
      %c0_i32_49 = arith.constant 0 : i32
      %79 = arith.cmpi ne, %78, %c0_i32_49 : i32
      scf.if %79 {
        %c0_51 = arith.constant 0 : index
        %c0_52 = arith.constant 0 : index
        %83 = vector.load %arg12[%c0_51, %c0_52] : memref<1x256xf32, #tpu.memory_space<vmem>>, vector<1x256xf32>
        tpu.vector_store %arg12[%c0_51, %c0_52], %77 {strides = array<i32>} : memref<1x256xf32, #tpu.memory_space<vmem>>, vector<1x256xf32>,
      } else {
      }
      %true = arith.constant true
      %80 = arith.xori %10, %true : i1
      %81 = arith.extui %80 : i1 to i32
      %c0_i32_50 = arith.constant 0 : i32
      %82 = arith.cmpi ne, %81, %c0_i32_50 : i32
      scf.if %82 {
        %c0_51 = arith.constant 0 : index
        %c0_52 = arith.constant 0 : index
        %83 = vector.load %arg11[%c0_51, %c0_52] : memref<1x256xf32, #tpu.memory_space<vmem>>, vector<1x256xf32>
        %c0_53 = arith.constant 0 : index
        %c0_54 = arith.constant 0 : index
        %84 = vector.load %arg12[%c0_53, %c0_54] : memref<1x256xf32, #tpu.memory_space<vmem>>, vector<1x256xf32>
        %85 = arith.mulf %84, %77 : vector<1x256xf32>
        %86 = arith.addf %83, %85 : vector<1x256xf32>
        %c0_55 = arith.constant 0 : index
        %c0_56 = arith.constant 0 : index
        %87 = vector.load %arg11[%c0_55, %c0_56] : memref<1x256xf32, #tpu.memory_space<vmem>>, vector<1x256xf32>
        tpu.vector_store %arg11[%c0_55, %c0_56], %86 {strides = array<i32>} : memref<1x256xf32, #tpu.memory_space<vmem>>, vector<1x256xf32>,
      } else {
      }
    } else {
    }
    %c3_i32 = arith.constant 3 : i32
    %52 = arith.cmpi eq, %arg0, %c3_i32 : i32
    %c1_i32_37 = arith.constant 1 : i32
    %53 = arith.cmpi eq, %arg1, %c1_i32_37 : i32
    %54 = arith.andi %52, %53 : i1
    %55 = arith.extui %54 : i1 to i32
    %c0_i32_38 = arith.constant 0 : i32
    %56 = arith.cmpi ne, %55, %c0_i32_38 : i32
    scf.if %56 {
      %c0_39 = arith.constant 0 : index
      %c0_40 = arith.constant 0 : index
      %57 = vector.load %arg11[%c0_39, %c0_40] : memref<1x256xf32, #tpu.memory_space<vmem>>, vector<1x256xf32>
      %c0_41 = arith.constant 0 : index
      %c0_42 = arith.constant 0 : index
      %58 = vector.load %arg10[%c0_41, %c0_42] : memref<1x256xf32, #tpu.memory_space<vmem>>, vector<1x256xf32>
      tpu.vector_store %arg10[%c0_41, %c0_42], %57 {strides = array<i32>} : memref<1x256xf32, #tpu.memory_space<vmem>>, vector<1x256xf32>,
    } else {
    }
    return
  }
  func.func @transform_0(%arg0: i32, %arg1: i32) -> (i32, i32) {
    %c0_i32 = arith.constant 0 : i32
    %c0_i32_0 = arith.constant 0 : i32
    %c0_i32_1 = arith.constant 0 : i32
    return %c0_i32, %c0_i32_0 : i32, i32
  }
  func.func @transform_1(%arg0: i32, %arg1: i32) -> (i32, i32) {
    %c0_i32 = arith.constant 0 : i32
    %c0_i32_0 = arith.constant 0 : i32
    %c0_i32_1 = arith.constant 0 : i32
    return %c0_i32, %c0_i32_0 : i32, i32
  }
  func.func @transform_2(%arg0: i32, %arg1: i32) -> (i32, i32, i32) {
    %c0_i32 = arith.constant 0 : i32
    %c0_i32_0 = arith.constant 0 : i32
    return %arg0, %c0_i32, %arg1 : i32, i32, i32
  }
  func.func @transform_3(%arg0: i32, %arg1: i32) -> (i32, i32, i32) {
    %c0_i32 = arith.constant 0 : i32
    %c0_i32_0 = arith.constant 0 : i32
    return %arg0, %c0_i32, %arg1 : i32, i32, i32
  }
  func.func @transform_4(%arg0: i32, %arg1: i32) -> (i32, i32, i32) {
    %c0_i32 = arith.constant 0 : i32
    %c0_i32_0 = arith.constant 0 : i32
    return %arg0, %arg1, %c0_i32 : i32, i32, i32
  }
  func.func @transform_5(%arg0: i32, %arg1: i32) -> (i32, i32, i32) {
    %c0_i32 = arith.constant 0 : i32
    %c0_i32_0 = arith.constant 0 : i32
    return %arg0, %c0_i32, %arg1 : i32, i32, i32
  }
  func.func @transform_6(%arg0: i32, %arg1: i32) -> (i32, i32, i32) {
    %c0_i32 = arith.constant 0 : i32
    %c0_i32_0 = arith.constant 0 : i32
    return %arg0, %c0_i32, %arg1 : i32, i32, i32
  }
  func.func @transform_7(%arg0: i32, %arg1: i32) -> (i32, i32, i32) {
    %c0_i32 = arith.constant 0 : i32
    %c0_i32_0 = arith.constant 0 : i32
    %c0_i32_1 = arith.constant 0 : i32
    return %arg0, %c0_i32, %c0_i32_0 : i32, i32, i32
  }
  func.func @transform_8(%arg0: i32, %arg1: i32) -> (i32, i32) {
    %c0_i32 = arith.constant 0 : i32
    %c0_i32_0 = arith.constant 0 : i32
    %c0_i32_1 = arith.constant 0 : i32
    return %c0_i32, %c0_i32_0 : i32, i32
  }
}

</mosaic_0001>

<bundles_post_ra>
// kernel: tpu_custom_call.1
= control target key start
LH: loop header
LB: loop body
LE: loop exit
PB: predicated region body
PF: predicated region fallthrough
CT: control target
= control target key end

     0   :  { %s2566_s0 = inlined_call_operand.hbm [shape: f32[16,256], index: 0, kind: input, shape index: {}]   ;;  %s2567_s1 = inlined_call_operand.hbm [shape: f32[16,256], index: 1, kind: input, shape index: {}]   ;;  %s2568_s2 = inlined_call_operand.hbm [shape: bf16[4,256,256], index: 2, kind: input, shape index: {}]   ;;  %s2569_s3 = inlined_call_operand.hbm [shape: bf16[4,256,256], index: 3, kind: input, shape index: {}]   ;;  %s2570_s4 = inlined_call_operand.hbm [shape: bf16[4,256,256], index: 4, kind: input, shape index: {}]   ;;  %s2571_s5 = inlined_call_operand.vmem [shape: f32[4,1,256], index: 5, kind: input, shape index: {}]   ;;  %s2572_s6 = inlined_call_operand.vmem [shape: f32[4,1,256], index: 6, kind: input, shape index: {}]   ;;  %s2573_s7 = inlined_call_operand.vmem [shape: f32[4,1,256], index: 7, kind: input, shape index: {}]   ;;  %s2574_s8 = inlined_call_operand.hbm [shape: f32[1,256], index: 8, kind: output, shape index: {}]  }
   0x1   :  { %2593 = sst [smem:[#allocation23_spill]] %s2566_s0 }
   0x2   :  { %2594 = sst [smem:[#allocation24_spill]] %s2568_s2 }
   0x3   :  { %2595 = sst [smem:[#allocation25_spill]] %s2571_s5 }
   0x4   :  { %2596 = sst [smem:[#allocation26_spill]] %s2572_s6 }
   0x5   :  { %2597 = sst [smem:[#allocation27_spill]] %s2573_s7 }
   0x6   :  { %2598 = sst [smem:[#allocation28_spill]] %s2574_s8 }
   0x7   :  { %13 = vsyncpa [#allocation6], 0 }
   0x8   :  { %14 = vsyncpa [#allocation9], 0 }
   0x9   :  { %15 = vsyncpa [#allocation7], 0  ;;  %s2098_s27 = smov 0   ;;  %s2100_s28 = smov 0  }
   0xa   :  { %s2102_s29 = smov 0   ;;  %s2104_s30 = smov 0  }
   0xb   :  { %s2106_s9 = smov 0   ;;  %s2108_s10 = smov 0  }
   0xc   :  { %s2110_s11 = smov 0   ;;  %s2112_s12 = smov 0  }
   0xd LB: > { %2599 = sst [smem:[#allocation18_spill]] %s2014_s29  ;;  %s2137_s13 = sadd.s32 4294967295, %s2034_s12   ;;  %s2034_s12 = sphi %s2112_s12, %s21_s12   ;;  %s2030_s11 = sphi %s2110_s11, %s2643_s11   ;;  %s2026_s10 = sphi %s2108_s10, %s2642_s10   ;;  %s2022_s9 = sphi %s2106_s9, %s2641_s9   ;;  %s2018_s30 = sphi %s2104_s30, %s2640_s30   ;;  %s2014_s29 = sphi %s2102_s29, %s2635_s29   ;;  %s2010_s28 = sphi %s2100_s28, %s2639_s28   ;;  %s2006_s27 = sphi %s2098_s27, %s2638_s27  }
   0xe   : > { %2600 = sst [smem:[#allocation19_spill]] %s2034_s12  ;;  %p91_p0 = scmp.ne.s32.totalorder %s2014_s29, %s2010_s28 }
   0xf   : > { %p92_p1 = scmp.eq.s32.totalorder %s2034_s12, 0  ;;  %p97_p2 = scmp.ne.s32.totalorder %s2010_s28, %s2006_s27 }
  0x10   : > { %p2575_p3 = scmp.eq.s32.totalorder %s2137_s13, 0  ;;  %p1461_p5 = scmp.ge.s32.totalorder %s2034_s12, 1 }
  0x11   : > { %p93_p4 = por %p92_p1, %p91_p0  ;;  %p267_p7 = scmp.lt.s32.totalorder %s2034_s12, 9 }
  0x12   : > { %p2148_p6 = por %p2575_p3, %p97_p2  ;;  %s2036_s17 = smov [#allocation5]  }
  0x13   : > { %p2153_p8 = pnand %p1461_p5, %p267_p7  ;;  %s279_s18 = sshll.u32 %s2036_s17, 4  ;;  %s280_s18 = int_to_ptr.vmem [resolvable:$true] %s279_s18 }
  0x14   : > { %s2601_s15 = scalar_select %p2148_p6, 1, 0 }
  0x15   : > { %s2602_s16 = scalar_select %p2153_p8, 1, 0 }
  0x16   : > { %p1608_p9 = pneg %p2153_p8  ;;  %p1627_p10 = scmp.lt.s32.totalorder %s2034_s12, 8 }
  0x17   : > { %s2605_s0 = sld [smem:[#allocation23_spill]] }
  0x18   : > { %p2162_p11 = pnand %p1608_p9, %p2575_p3  ;;  %p2166_p12 = pnand %p1627_p10, %p93_p4 }
  0x1a   : > { %s2603_s19 = scalar_select %p2162_p11, 1, 0 }
  0x1b   : > { %s2604_s20 = scalar_select %p2166_p12, 1, 0 }
  0x1c   : > { %p2585_p0 = pneg %p2162_p11 }
  0x1d   : > { %s1784_s23 = scalar_lea.hbm %s2605_s0, 512 }
  0x1e   : > { %p1785_p13 = scmp.ne.s32.totalorder %s2605_s0, %s1784_s23  ;;  %p1791_p4 = scmp.lt.u32.totalorder %s1784_s23, %s2605_s0 }
  0x20   : > { %p1787_p1 = pnand %p2585_p0, %p1785_p13 }
  0x22   : > { %p1788_p2 = pneg %p1787_p1 }
  0x24   : > { %p1793_p5 = pnand %p1791_p4, %p1788_p2 }
  0x26   : > { %1796 = shalt.err (!%p1793_p5)
}
  0x27   : > { %s1797_s17 = scalar_lea.vmem %s280_s18, 512  ;;  %p1805_p3 = scmp.lt.s32.totalorder %s280_s18, %s280_s18 }
  0x28   : > { %p1798_p7 = scmp.ne.s32.totalorder %s280_s18, %s1797_s17  ;;  %p1806_p6 = scmp.lt.s32.totalorder %s1797_s17, %s1797_s17 }
  0x2a   : > { %p1800_p9 = pnand %p1798_p7, %p2585_p0  ;;  %p1807_p8 = por %p1806_p6, %p1805_p3 }
  0x2c   : > { %p1801_p10 = pneg %p1800_p9 }
  0x2e   : > { %p1808_p12 = pnand %p1807_p8, %p1801_p10 }
  0x30   : > { %1811 = shalt.err (!%p1808_p12)
}
  0x31   : > { %s2580_s21 = smov 256   ;;  %s2581_s22 = smov 16  }
  0x32   : > { %1611 = dma.hbm_to_vmem [thread:$0]  (!%p2162_p11), %s2605_s0, 512, %s280_s18, [#allocation6], %s2580_s21, %s2580_s21, %s2581_s22  }
  0x33   : > { %s30_s25 = sadd.s32 1, %s2026_s10  ;;  %s33_s26 = sadd.s32 1, %s2030_s11 }
  0x34   : > { %p31_p3 = scmp.ge.s32.totalorder %s30_s25, 2  ;;  %s306_s27 = sand.u32 1, %s2034_s12  }
  0x35   : > { %s308_s17 = sand.u32 1, %s2014_s29   ;;  %s2584_s23 = sshll.u32 %s2030_s11, 6 }
  0x36   : > { %s2645_s25 = smov (%p31_p3, %s30_s25), 0  ;;  %s2647_s26 = smov (!%p31_p3, %s33_s26), %s2030_s11 }
  0x37   : > { %2606 = sst [smem:[#allocation20_spill]] %s2645_s25  ;;  %s80_s14 = ssub.s32 %s2026_s10, %s2645_s25 }
  0x38   : > { %s2204_s8 = sshll.u32 %s308_s17, 7  ;;  %p35_p6 = scmp.ge.s32.totalorder %s2647_s26, 4 }
  0x39   : > { %s310_s18 = scalar_lea.vmem [#allocation10], %s2204_s8  ;;  %s2213_s21 = sadd.s32 %s2026_s10, %s2584_s23 }
  0x3a   : > { %s318_s24 = sshll.u32 %s310_s18, 4  ;;  %s2649_s26 = smov (%p35_p6, %s2647_s26), 0  ;;  %s2215_s24 = int_to_ptr.vmem [resolvable:$true] %s318_s24 }
  0x3b   : > { %2607 = sst [smem:[#allocation21_spill]] %s2649_s26  ;;  %s79_s22 = ssub.s32 %s2030_s11, %s2649_s26 }
  0x3c   : > { %s1467_s0 = sshll.u32 %s2213_s21, 6  ;;  %s81_s17 = sor.u32 %s80_s14, %s79_s22 }
  0x3d   : > { %s2608_s2 = sld [smem:[#allocation24_spill]]  ;;  %p82_p8 = scmp.eq.s32.totalorder %s81_s17, 0 }
  0x3e   : > { %s2609_s18 = sadd.s32 1, %s2014_s29  ;;  %s2232_s5 = scalar_lea.sflag [#allocation6], %s306_s27 }
  0x3f   : > { %s2230_s23 = scalar_select %p82_p8, %s2014_s29, %s2609_s18  }
  0x40   : > { %p2611_p13 = scmp.ne.s32.totalorder %s2604_s20, 0 }
  0x41   : > { %2610 = sst [smem:[#allocation22_spill]] %s2230_s23 }
  0x42   : > { %p2238_p1 = pneg %p2611_p13 }
  0x43   : > { %s2225_s6 = scalar_lea.hbm %s2608_s2, %s1467_s0  ;;  %s1817_s25 = scalar_lea.hbm %s2608_s2, 16384 }
  0x44   : > { %s1812_s7 = scalar_lea.hbm %s2225_s6, 2048  ;;  %p1818_p5 = scmp.lt.u32.totalorder %s2225_s6, %s2608_s2 }
  0x45   : > { %p1813_p12 = scmp.ne.s32.totalorder %s2225_s6, %s1812_s7  ;;  %p1819_p7 = scmp.lt.u32.totalorder %s1817_s25, %s1812_s7 }
  0x46   : > { %s2612_s14 = scalar_select %p2238_p1, 1, 0 }
  0x47   : > { %p1815_p2 = pnand %p2238_p1, %p1813_p12  ;;  %p1820_p9 = por %p1819_p7, %p1818_p5 }
  0x48   : > { %p1821_p10 = scmp.lt.u32.totalorder %s1812_s7, %s2225_s6 }
  0x49   : > { %p1816_p4 = pneg %p1815_p2 }
  0x4a   : > { %p1822_p3 = por %p1821_p10, %p1820_p9 }
  0x4c   : > { %p1823_p6 = pnand %p1822_p3, %p1816_p4 }
  0x4e   : > { %1826 = shalt.err (!%p1823_p6)
}
  0x4f   : > { %s1827_s27 = scalar_lea.vmem %s2215_s24, 2048  ;;  %s2039_s12 = smov [#allocation10]  }
  0x50   : > { %p1828_p8 = scmp.ne.s32.totalorder %s2215_s24, %s1827_s27  ;;  %s1832_s22 = sshll.u32 %s2039_s12, 4  ;;  %s1833_s22 = int_to_ptr.vmem [resolvable:$false] %s1832_s22 }
  0x51   : > { %s1834_s17 = scalar_lea.vmem %s1833_s22, 4096  ;;  %p1835_p0 = scmp.lt.s32.totalorder %s2215_s24, %s1833_s22 }
  0x52   : > { %p1830_p12 = pnand %p1828_p8, %p2238_p1  ;;  %p1836_p11 = scmp.lt.s32.totalorder %s1834_s17, %s1827_s27 }
  0x54   : > { %p1831_p2 = pneg %p1830_p12  ;;  %p1837_p5 = por %p1836_p11, %p1835_p0 }
  0x56   : > { %p1838_p7 = pnand %p1837_p5, %p1831_p2 }
  0x58   : > { %1841 = shalt.err (!%p1838_p7)
}
  0x59   : > { %s2040_s7 = smov 128   ;;  %s2041_s25 = smov 64  }
  0x5a   : > { %s2042_s18 = smov 4   ;;  %s2270_s22 = scalar_lea.hbm %s2569_s3, %s1467_s0 }
  0x5b   : > { %1618 = dma.hbm_to_vmem [thread:$0]  (!%p2611_p13), %s2225_s6, 2048, %s2215_s24, %s2232_s5, %s2040_s7, %s2041_s25, %s2042_s18  }
  0x5c   : > { %s332_s17 = scalar_lea.vmem [#allocation11], %s2204_s8  ;;  %s2043_s26 = smov [#allocation8]  }
  0x5d   : > { %s340_s2 = sshll.u32 %s332_s17, 4  ;;  %s2275_s23 = sshll.u32 %s2043_s26, 4  ;;  %s2273_s2 = int_to_ptr.vmem [resolvable:$true] %s340_s2  ;;  %s293_s23 = int_to_ptr.vmem [resolvable:$true] %s2275_s23 }
  0x5e   : > { %s1842_s29 = scalar_lea.hbm %s2270_s22, 2048  ;;  %s1847_s0 = scalar_lea.hbm %s2569_s3, 16384 }
  0x5f   : > { %p1843_p11 = scmp.ne.s32.totalorder %s2270_s22, %s1842_s29  ;;  %p1848_p9 = scmp.lt.u32.totalorder %s2270_s22, %s2569_s3 }
  0x60   : > { %p1849_p10 = scmp.lt.u32.totalorder %s1847_s0, %s1842_s29  ;;  %p1851_p6 = scmp.lt.u32.totalorder %s1842_s29, %s2270_s22 }
  0x61   : > { %p1845_p0 = pnand %p1843_p11, %p2238_p1 }
  0x62   : > { %p1850_p3 = por %p1849_p10, %p1848_p9 }
  0x63   : > { %p1846_p4 = pneg %p1845_p0 }
  0x64   : > { %p1852_p8 = por %p1851_p6, %p1850_p3 }
  0x66   : > { %p1853_p12 = pnand %p1852_p8, %p1846_p4 }
  0x68   : > { %1856 = shalt.err (!%p1853_p12)
}
  0x69   : > { %s1857_s26 = scalar_lea.vmem %s2273_s2, 2048  ;;  %s2044_s12 = smov [#allocation11]  }
  0x6a   : > { %p1858_p2 = scmp.ne.s32.totalorder %s2273_s2, %s1857_s26  ;;  %s1862_s17 = sshll.u32 %s2044_s12, 4  ;;  %s1863_s17 = int_to_ptr.vmem [resolvable:$false] %s1862_s17 }
  0x6b   : > { %s1864_s6 = scalar_lea.vmem %s1863_s17, 4096  ;;  %p1865_p11 = scmp.lt.s32.totalorder %s2273_s2, %s1863_s17 }
  0x6c   : > { %p1860_p5 = pnand %p1858_p2, %p2238_p1  ;;  %p1866_p0 = scmp.lt.s32.totalorder %s1864_s6, %s1857_s26 }
  0x6e   : > { %p1861_p7 = pneg %p1860_p5  ;;  %p1867_p9 = por %p1866_p0, %p1865_p11 }
  0x70   : > { %p1868_p10 = pnand %p1867_p9, %p1861_p7 }
  0x72   : > { %1871 = shalt.err (!%p1868_p10)
}
  0x73   : > { %1621 = dma.hbm_to_vmem [thread:$0]  (!%p2611_p13), %s2270_s22, 2048, %s2273_s2, %s2232_s5, %s2040_s7, %s2041_s25, %s2042_s18  }
  0x74   : > { %s1872_s0 = scalar_lea.hbm %s2567_s1, 512  ;;  %p2613_p3 = scmp.ne.s32.totalorder %s2603_s19, 0 }
  0x75   : > { %p1873_p4 = scmp.ne.s32.totalorder %s2567_s1, %s1872_s0  ;;  %p1879_p2 = scmp.lt.u32.totalorder %s1872_s0, %s2567_s1 }
  0x76   : > { %p2614_p6 = pneg %p2613_p3 }
  0x78   : > { %p1875_p8 = pnand %p1873_p4, %p2614_p6 }
  0x7a   : > { %p1876_p12 = pneg %p1875_p8 }
  0x7c   : > { %p1881_p5 = pnand %p1879_p2, %p1876_p12 }
  0x7e   : > { %1884 = shalt.err (!%p1881_p5)
}
  0x7f   : > { %s1885_s2 = scalar_lea.vmem %s293_s23, 512  ;;  %p2615_p11 = pmov %p2614_p6 }
  0x80   : > { %p1886_p7 = scmp.ne.s32.totalorder %s293_s23, %s1885_s2  ;;  %p1893_p10 = scmp.lt.s32.totalorder %s293_s23, %s293_s23 }
  0x81   : > { %p1894_p13 = scmp.lt.s32.totalorder %s1885_s2, %s1885_s2 }
  0x82   : > { %p1888_p0 = pnand %p1886_p7, %p2615_p11 }
  0x83   : > { %p1895_p1 = por %p1894_p13, %p1893_p10 }
  0x84   : > { %p1889_p9 = pneg %p1888_p0 }
  0x86   : > { %p1896_p4 = pnand %p1895_p1, %p1889_p9 }
  0x88   : > { %1899 = shalt.err (!%p1896_p4)
}
  0x89   : > { %s2616_s25 = smov 16   ;;  %s2617_s18 = smov 256  }
  0x8a   : > { %1614 = dma.hbm_to_vmem [thread:$0]  (!%p2613_p3), %s2567_s1, 512, %s293_s23, [#allocation9], %s2617_s18, %s2617_s18, %s2616_s25  }
  0x8b   : > { %s1545_s6 = sshll.u32 %s2026_s10, 5  ;;  %s354_s29 = scalar_lea.vmem [#allocation12], %s2204_s8 }
  0x8c   : > { %s364_s21 = sshll.u32 %s354_s29, 4  ;;  %s2618_s0 = sshll.u32 %s2030_s11, 6  ;;  %s2330_s21 = int_to_ptr.vmem [resolvable:$true] %s364_s21 }
  0x8d   : > { %s361_s24 = sadd.s32 %s1545_s6, %s2618_s0  ;;  %p2619_p1 = scmp.ne.s32.totalorder %s2612_s14, 0 }
  0x8e   : > { %s1475_s27 = sshll.u32 %s361_s24, 6  ;;  %s1905_s25 = scalar_lea.hbm %s2570_s4, 16384 }
  0x8f   : > { %s2335_s12 = scalar_lea.hbm %s2570_s4, %s1475_s27 }
  0x90   : > { %s1900_s2 = scalar_lea.hbm %s2335_s12, 2048  ;;  %p1906_p8 = scmp.lt.u32.totalorder %s2335_s12, %s2570_s4 }
  0x91   : > { %p1901_p13 = scmp.ne.s32.totalorder %s2335_s12, %s1900_s2  ;;  %p1907_p12 = scmp.lt.u32.totalorder %s1905_s25, %s1900_s2 }
  0x92   : > { %p1909_p5 = scmp.lt.u32.totalorder %s1900_s2, %s2335_s12 }
  0x93   : > { %p1903_p3 = pnand %p1901_p13, %p2619_p1  ;;  %p1908_p2 = por %p1907_p12, %p1906_p8 }
  0x95   : > { %p1904_p6 = pneg %p1903_p3  ;;  %p1910_p7 = por %p1909_p5, %p1908_p2 }
  0x97   : > { %p1911_p11 = pnand %p1910_p7, %p1904_p6 }
  0x99   : > { %1914 = shalt.err (!%p1911_p11)
}
  0x9a   : > { %s1915_s17 = scalar_lea.vmem %s2330_s21, 2048  ;;  %s2045_s6 = smov [#allocation12]  }
  0x9b   : > { %p1916_p0 = scmp.ne.s32.totalorder %s2330_s21, %s1915_s17  ;;  %s1920_s29 = sshll.u32 %s2045_s6, 4  ;;  %s1921_s29 = int_to_ptr.vmem [resolvable:$false] %s1920_s29 }
  0x9c   : > { %s1922_s0 = scalar_lea.vmem %s1921_s29, 4096  ;;  %p1923_p4 = scmp.lt.s32.totalorder %s2330_s21, %s1921_s29 }
  0x9d   : > { %p1918_p9 = pnand %p1916_p0, %p2619_p1  ;;  %p1924_p13 = scmp.lt.s32.totalorder %s1922_s0, %s1915_s17 }
  0x9f   : > { %p1919_p10 = pneg %p1918_p9  ;;  %p1925_p3 = por %p1924_p13, %p1923_p4 }
  0xa1   : > { %p1926_p8 = pnand %p1925_p3, %p1919_p10 }
  0xa3   : > { %1929 = shalt.err (!%p1926_p8)
}
  0xa4   : > { %s2046_s24 = smov 8   ;;  %p2620_p6 = scmp.ne.s32.totalorder %s2604_s20, 0 }
  0xa5   : > { %p2621_p1 = scmp.ne.s32.totalorder %s2602_s16, 0 }
  0xa6   : > { %1624 = dma.hbm_to_vmem [thread:$0]  (!%p2620_p6), %s2335_s12, 2048, %s2330_s21, %s2232_s5, %s2040_s7, %s2040_s7, %s2046_s24  }
  0xa7   : > { %403 = sbr.rel (%p2621_p1) target bundleno = 1130 (0x46a), region = 52  ;;  %p2622_p12 = scmp.eq.s32.totalorder (!%p2621_p1), %s2137_s13, 0 }
  0xae   : > { %1989 = dma.done.wait (%p2622_p12), [#allocation6], 512   ;;  %p2623_p2 = pmov %p2622_p12 }
  0xb0   : > { %1991 = vsyncadd (%p2623_p2), [#allocation6], 4294966784  ;;  %p2624_p5 = pmov %p2623_p2 }
  0xb1   : > { %p2625_p7 = pmov %p2623_p2 }
  0xb2   : > { %1993 = dma.done.wait (%p2624_p5), [#allocation9], 512  }
  0xb3   : > { %1995 = vsyncadd (%p2625_p7), [#allocation9], 4294966784  ;;  %s413_s20 = sand.u32 1, %s2137_s13   ;;  %s415_s5 = sand.u32 1, %s2010_s28  }
  0xb4   : > { %s1479_s14 = sshll.u32 %s415_s5, 7  ;;  %s414_s16 = scalar_lea.sflag [#allocation6], %s413_s20 }
  0xb5   : > { %s2373_s7 = scalar_lea.vmem [#allocation10], %s1479_s14  ;;  %p2626_p11 = scmp.ne.s32.totalorder %s2601_s15, 0 }
  0xb7   : > { %1997 = dma.done.wait (%p2626_p11), %s414_s16, 6144  }
  0xb8   : > { %1999 = vsyncadd (%p2626_p11), %s414_s16, 4294961152  ;;  %p492_p0 = scmp.lt.s32.totalorder %s2022_s9, 3  ;;  %p494_p9 = scmp.lt.s32.totalorder %s2018_s30, 1 }
  0xb9   : > { %p511_p10 = scmp.lt.s32.totalorder %s2022_s9, 0  ;;  %s512_s21 = ssub.s32 0, %s2022_s9 }
  0xba   : > { %s493_s27 = scalar_select %p492_p0, %s2022_s9, 3 }
  0xbb   : > { %s495_s19 = scalar_select %p494_p9, %s2018_s30, 1 }
  0xbc   : > { %s1482_s26 = sshll.u32 %s493_s27, 1  ;;  %s1485_s12 = smin.u32 %s2022_s9, %s512_s21 }
  0xbd   : > { %s2386_s15 = sadd.s32 %s1482_s26, %s495_s19  ;;  %s2627_s23 = sld [smem:[#allocation27_spill]] }
  0xbe   : > { %s2628_s17 = sld [smem:[#allocation25_spill]]  ;;  %s2629_s24 = sld [smem:[#allocation26_spill]] }
  0xbf   : > { %s514_s5 = sand.u32 1, %s1485_s12   ;;  %p524_p4 = scmp.eq.s32.totalorder %s2022_s9, 0 }
  0xc0   : > { %s515_s16 = ssub.s32 0, %s514_s5  ;;  %p525_p13 = scmp.eq.s32.totalorder %s2018_s30, 0 }
  0xc1   : > { %s2651_s16 = smov (!%p511_p10, %s515_s16), %s514_s5  ;;  %s2408_s27 = scalar_lea.vmem [#allocation11], %s1479_s14 }
  0xc2   : > { %p526_p3 = pnand %p525_p13, %p524_p4  ;;  %p1487_p8 = scmp.lt.s32.totalorder %s2651_s16, 0 }
  0xc3   : > { %s2391_s25 = scalar_lea.vmem %s2627_s23, %s1482_s26  ;;  %s521_s21 = sadd.s32 2, %s2651_s16  ;;  %v530_v0 = vld [vmem:[#allocation5] sm:$0xff] (!%p526_p3)  ;;  %v531_v1 = vld [vmem:[#allocation5 + $0x8] sm:$0xff] (!%p526_p3)  ;;  %v532_v2 = vld [vmem:[#allocation5 + $0x10] sm:$0xff] (!%p526_p3)  ;;  %v578_v26 = vlaneseq (!%p526_p3)  ;;  %v2047_v30 = vmov (!%p526_p3), 1966171168  }
  0xc4   : > { %s498_s6 = scalar_lea.vmem %s2628_s17, %s2386_s15  ;;  %s505_s20 = scalar_lea.vmem %s2629_s24, %s2386_s15  ;;  %v533_v3 = vld [vmem:[#allocation5 + $0x18] sm:$0xff] (!%p526_p3)  ;;  %v534_v4 = vadd.f32 (!%p526_p3), %v532_v2, %v530_v0  ;;  %v550_v5 = vld [vmem:[#allocation8] sm:$0xff] (!%p526_p3)  ;;  %v551_v6 = vld [vmem:[#allocation8 + $0x8] sm:$0xff] (!%p526_p3)  ;;  %v576_v31 = vunpack.c.l.s4 (!%p526_p3), %v2047_v30 }
  0xc5   : > { %s2653_s21 = smov (!%p1487_p8, %s521_s21), %s2651_s16  ;;  %s2410_s19 = scalar_lea.vmem [#allocation12], %s1479_s14  ;;  %v541_v7 = vadd.f32 (!%p526_p3), %v533_v3, %v531_v1  ;;  %v552_v8 = vld [vmem:[#allocation8 + $0x10] sm:$0xff] (!%p526_p3)  ;;  %v553_v9 = vld [vmem:[#allocation8 + $0x18] sm:$0xff] (!%p526_p3)  ;;  %v579_v37 = vshrl.u32 (!%p526_p3), %v578_v26, 7  ;;  %vm592_vm0 = vcmp.lt.s32.totalorder (!%p526_p3), %v578_v26, 256 }
  0xc6   : > { %p523_p6 = scmp.eq.s32.totalorder %s2653_s21, 0  ;;  %529 = sbr.rel (%p526_p3) target bundleno = 223 (0xdf), region = 76  ;;  %v535_v10 = vrot.slane (!%p526_p3), %v534_v4, 4  ;;  %v554_v11 = vadd.f32 (!%p526_p3), %v552_v8, %v550_v5  ;;  %v561_v12 = vadd.f32 (!%p526_p3), %v553_v9, %v551_v6  ;;  %v577_v41 = vunpack.c.0.s8 (!%p526_p3), %v576_v31 }
  0xc7   : > { %v542_v13 = vrot.slane (!%p526_p3), %v541_v7, 4 }
  0xc8   : > { %v536_v14 = vadd.f32 (!%p526_p3), %v535_v10, %v534_v4  ;;  %v555_v15 = vrot.slane (!%p526_p3), %v554_v11, 4  ;;  %v562_v16 = vrot.slane (!%p526_p3), %v561_v12, 4  ;;  %v580_v47 = vsub.s32 (!%p526_p3), %v577_v41, %v579_v37 }
  0xc9   : > { %v543_v17 = vadd.f32 (!%p526_p3), %v542_v13, %v541_v7 }
  0xca   : > { %v537_v18 = vrot.slane (!%p526_p3), %v536_v14, 2  ;;  %v556_v19 = vadd.f32 (!%p526_p3), %v555_v15, %v554_v11  ;;  %v563_v20 = vadd.f32 (!%p526_p3), %v562_v16, %v561_v12 }
  0xcb   : > { %v544_v21 = vrot.slane (!%p526_p3), %v543_v17, 2 }
  0xcc   : > { %v538_v22 = vadd.f32 (!%p526_p3), %v537_v18, %v536_v14  ;;  %v557_v23 = vrot.slane (!%p526_p3), %v556_v19, 2  ;;  %v564_v24 = vrot.slane (!%p526_p3), %v563_v20, 2 }
  0xcd   : > { %v545_v25 = vadd.f32 %v544_v21, %v543_v17 }
  0xce   : > { %v539_v27 = vrot.slane %v538_v22, 1  ;;  %v558_v28 = vadd.f32 %v557_v23, %v556_v19  ;;  %v565_v29 = vadd.f32 %v564_v24, %v563_v20 }
  0xcf   : > { %v546_v32 = vrot.slane %v545_v25, 1 }
  0xd0   : > { %v540_v33 = vadd.f32 %v539_v27, %v538_v22  ;;  %v559_v34 = vrot.slane %v558_v28, 1  ;;  %v566_v35 = vrot.slane %v565_v29, 1 }
  0xd1   : > { %v547_v36 = vadd.f32 %v546_v32, %v545_v25 }
  0xd2   : > { %v548_v38 = vmul.f32 0.125, %v540_v33  ;;  %v560_v39 = vadd.f32 %v559_v34, %v558_v28  ;;  %v567_v40 = vadd.f32 %v566_v35, %v565_v29 }
  0xd3   : > { %v549_v42 = vmul.f32 0.125, %v547_v36 }
  0xd4   : > { %v568_v43 = vmul.f32 0.0625, %v560_v39  ;;  %v569_v44 = vmul.f32 0.0625, %v567_v40 }
  0xd6   : > { %v570_v45 = vmul.f32 %v568_v43, %v548_v38  ;;  %v571_v46 = vmul.f32 %v569_v44, %v549_v42 }
  0xd8   : > { %v574_v48 = vcombine.low %v570_v45, %v571_v46 }
  0xda   : > { %v581_v49 = vrot.slane %v574_v48, %v580_v47 }
  0xdc   : > { %v588_v50 = vrot.slane %v581_v49, %v580_v47 }
  0xde   : > { %594 = vst.msk [vmem:[#allocation2] sm:$0x3] %vm592_vm0, %v588_v50 }
  0xdf PF: > { %p1488_p1 = scmp.ne.s32.totalorder %s2018_s30, 0 }
  0xe0   : > { %v2048_v51 = vmov (!%p1488_p1), 0.0  }
  0xe1   : > { %597 = sbr.rel (%p1488_p1) target bundleno = 232 (0xe8), region = 80  ;;  %598 = vst [vmem:[#allocation4] sm:$0xff] (!%p1488_p1), %v2048_v51  ;;  %599 = vst [vmem:[#allocation4 + $0x8] sm:$0xff] (!%p1488_p1), %v2048_v51 }
  0xe2   : > { %600 = vst [vmem:[#allocation4 + $0x10] sm:$0xff] (!%p1488_p1), %v2048_v51  ;;  %601 = vst [vmem:[#allocation4 + $0x18] sm:$0xff] (!%p1488_p1), %v2048_v51 }
  0xe8 PF: > { %v1710_v52 = vld [vmem:[%s2373_s7 + $0x40] sm:$0xff]   ;;  %v1714_v56 = vld [vmem:[%s2373_s7 + $0x48] sm:$0xff]   ;;  %v1718_v60 = vld [vmem:[%s2373_s7 + $0x50] sm:$0xff]   ;;  %v799_v10 = vlaneseq  ;;  %s610_s14 = scalar_select %p523_p6, 1, 0 }
  0xe9   : > { %v1711_v53 = vld [vmem:[%s2408_s27 + $0x40] sm:$0xff]   ;;  %1546 = vmatprep.subr.bf16.mxu0 %v1710_v52  ;;  %v1715_v57 = vld [vmem:[%s2408_s27 + $0x48] sm:$0xff]   ;;  %v1719_v61 = vld [vmem:[%s2408_s27 + $0x50] sm:$0xff]   ;;  %p1139_p12 = scmp.eq.s32.totalorder %s2018_s30, 1  ;;  %p1538_p2 = scmp.ne.s32.totalorder %s2018_s30, 1 }
  0xea   : > { %v1712_v54 = vld [vmem:[%s2373_s7] sm:$0xff]   ;;  %1568 = vmatprep.subr.bf16.mxu1 %v1711_v53  ;;  %v1716_v58 = vld [vmem:[%s2373_s7 + $0x8] sm:$0xff]   ;;  %v1720_v62 = vld [vmem:[%s2373_s7 + $0x10] sm:$0xff]   ;;  %v2440_v15 = vshrl.u32 %v799_v10, 7  ;;  %v611_v30 = vstv %s610_s14  ;;  %p1539_p5 = scmp.ne.s32.totalorder (!%p1538_p2), %s2653_s21, 0 }
  0xeb   : > { %v1713_v55 = vld [vmem:[%s2408_s27] sm:$0xff]   ;;  %1547 = vmatpush3.bf16.msra.mxu0 %v1712_v54  ;;  %v1717_v59 = vld [vmem:[%s2408_s27 + $0x8] sm:$0xff]   ;;  %v1721_v63 = vld [vmem:[%s2408_s27 + $0x10] sm:$0xff]   ;;  %vm612_vm1 = vcmp.eq.s32.totalorder %v611_v30, 1 }
  0xec   : > { %1569 = vmatpush3.bf16.msra.mxu1 %v1713_v55  ;;  %1548 = vmatprep.subr.bf16.mxu0 %v1714_v56  ;;  %v1722_v0 = vld [vmem:[%s2373_s7 + $0x58] sm:$0xff]   ;;  %v1726_v4 = vld [vmem:[%s2373_s7 + $0x60] sm:$0xff]   ;;  %v1730_v8 = vld [vmem:[%s2373_s7 + $0x68] sm:$0xff]   ;;  %v2447_v20 = vsub.s32 0, %v2440_v15  ;;  %v805_v22 = vsub.s32 1, %v2440_v15 }
  0xed   : > { %1570 = vmatprep.subr.bf16.mxu1 %v1715_v57  ;;  %v1723_v1 = vld [vmem:[%s2408_s27 + $0x58] sm:$0xff]   ;;  %v1727_v5 = vld [vmem:[%s2408_s27 + $0x60] sm:$0xff]   ;;  %v1731_v9 = vld [vmem:[%s2408_s27 + $0x68] sm:$0xff]   ;;  %v2049_v57 = vmov 0  }
  0xee   : > { %v1724_v2 = vld [vmem:[%s2373_s7 + $0x18] sm:$0xff]   ;;  %v1728_v6 = vld [vmem:[%s2373_s7 + $0x20] sm:$0xff]   ;;  %v1732_v11 = vld [vmem:[%s2373_s7 + $0x28] sm:$0xff]  }
  0xef   : > { %1549 = vmatpush3.bf16.msra.mxu0 %v1716_v58  ;;  %v1725_v3 = vld [vmem:[%s2408_s27 + $0x18] sm:$0xff]   ;;  %v1729_v7 = vld [vmem:[%s2408_s27 + $0x20] sm:$0xff]   ;;  %v1733_v12 = vld [vmem:[%s2408_s27 + $0x28] sm:$0xff]  }
  0xf0   : > { %1571 = vmatpush3.bf16.msra.mxu1 %v1717_v59  ;;  %1550 = vmatprep.subr.bf16.mxu0 %v1718_v60  ;;  %v1734_v13 = vld [vmem:[%s2373_s7 + $0x70] sm:$0xff]   ;;  %v1738_v18 = vld [vmem:[%s2373_s7 + $0x78] sm:$0xff]   ;;  %v603_v24 = vld [vmem:[#allocation5 + $0x8] sm:$0xff] }
  0xf1   : > { %1572 = vmatprep.subr.bf16.mxu1 %v1719_v61  ;;  %v1735_v14 = vld [vmem:[%s2408_s27 + $0x70] sm:$0xff]   ;;  %v1739_v19 = vld [vmem:[%s2408_s27 + $0x78] sm:$0xff]   ;;  %v607_v26 = vld [vmem:[#allocation8 + $0x8] sm:$0xff] }
  0xf2   : > { %v1736_v16 = vld [vmem:[%s2373_s7 + $0x30] sm:$0xff]   ;;  %v1740_v21 = vld [vmem:[%s2373_s7 + $0x38] sm:$0xff]   ;;  %v602_v29 = vld [vmem:[#allocation5] sm:$0xff]  ;;  %v2457_v36 = vsel %vm612_vm1, %v603_v24, %v607_v26 }
  0xf3   : > { %1551 = vmatpush3.bf16.msra.mxu0 %v1720_v62  ;;  %v1737_v17 = vld [vmem:[%s2408_s27 + $0x30] sm:$0xff]   ;;  %v1741_v23 = vld [vmem:[%s2408_s27 + $0x38] sm:$0xff]   ;;  %v606_v34 = vld [vmem:[#allocation8] sm:$0xff] }
  0xf4   : > { %1573 = vmatpush3.bf16.msra.mxu1 %v1721_v63  ;;  %1552 = vmatprep.subr.bf16.mxu0 %v1722_v0  ;;  %v605_v25 = vld [vmem:[#allocation5 + $0x18] sm:$0xff]  ;;  %v604_v33 = vld [vmem:[#allocation5 + $0x10] sm:$0xff]  ;;  %v1744_v40 = vld [vmem:[%s2410_s19 + $0x4] ss:$8 sps:$4 sm:$0xff]   ;;  %v2464_v42 = vsel %vm612_vm1, %v602_v29, %v606_v34 }
  0xf5   : > { %1574 = vmatprep.subr.bf16.mxu1 %v1723_v1  ;;  %v609_v27 = vld [vmem:[#allocation8 + $0x18] sm:$0xff]  ;;  %v608_v35 = vld [vmem:[#allocation8 + $0x10] sm:$0xff]  ;;  %v1742_v44 = vld [vmem:[%s2410_s19] ss:$8 sps:$4 sm:$0xff]  }
  0xf6   : > { %v617_v28 = vld [vmem:[#allocation2] sm:$0x3]  ;;  %v2459_v37 = vsel %vm612_vm1, %v605_v25, %v609_v27  ;;  %v2466_v43 = vsel %vm612_vm1, %v604_v33, %v608_v35  ;;  %v1745_v47 = vld [vmem:[%s2410_s19 + $0x10] ss:$8 sps:$4 sm:$0xff]   ;;  %v1750_v48 = vld [vmem:[%s2410_s19 + $0x24] ss:$8 sps:$4 sm:$0xff]  }
  0xf7   : > { %1553 = vmatpush3.bf16.msra.mxu0 %v1724_v2  ;;  %v802_v31 = vrot.slane %v617_v28, %v2447_v20  ;;  %v806_v32 = vrot.slane %v617_v28, %v805_v22  ;;  %v619_v41 = vpack.c.bf16 %v2459_v37, %v2457_v36  ;;  %v618_v45 = vpack.c.bf16 %v2466_v43, %v2464_v42  ;;  %v1747_v46 = vld [vmem:[%s2410_s19 + $0x14] ss:$8 sps:$4 sm:$0xff]   ;;  %v1748_v49 = vld [vmem:[%s2410_s19 + $0x20] ss:$8 sps:$4 sm:$0xff]   ;;  %v1751_v51 = vld [vmem:[%s2410_s19 + $0x30] ss:$8 sps:$4 sm:$0xff]  }
  0xf8   : > { %1575 = vmatpush3.bf16.msra.mxu1 %v1725_v3  ;;  %1554 = vmatprep.subr.bf16.mxu0 %v1726_v4  ;;  %v1753_v50 = vld [vmem:[%s2410_s19 + $0x34] ss:$8 sps:$4 sm:$0xff]   ;;  %v1756_v52 = vld [vmem:[%s2410_s19 + $0x44] ss:$8 sps:$4 sm:$0xff]   ;;  %v1754_v53 = vld [vmem:[%s2410_s19 + $0x40] ss:$8 sps:$4 sm:$0xff]  }
  0xf9   : > { %1576 = vmatprep.subr.bf16.mxu1 %v1727_v5  ;;  %v809_v38 = vpack.c.bf16 %v802_v31, %v802_v31  ;;  %v810_v39 = vpack.c.bf16 %v806_v32, %v806_v32  ;;  %787 = vmatprep.mubr.bf16.mxu0 %v619_v41  ;;  %v1757_v54 = vld [vmem:[%s2410_s19 + $0x50] ss:$8 sps:$4 sm:$0xff]   ;;  %v1759_v55 = vld [vmem:[%s2410_s19 + $0x54] ss:$8 sps:$4 sm:$0xff]   ;;  %v1762_v56 = vld [vmem:[%s2410_s19 + $0x64] ss:$8 sps:$4 sm:$0xff]  }
  0xfa   : > { %v1760_v58 = vld [vmem:[%s2410_s19 + $0x60] ss:$8 sps:$4 sm:$0xff]   ;;  %v1765_v59 = vld [vmem:[%s2410_s19 + $0x74] ss:$8 sps:$4 sm:$0xff]   ;;  %v1763_v60 = vld [vmem:[%s2410_s19 + $0x70] ss:$8 sps:$4 sm:$0xff]  }
  0xfb   : > { %1555 = vmatpush3.bf16.msra.mxu0 %v1728_v6  ;;  %972 = vmatprep.mubr.bf16.mxu1 %v810_v39  ;;  %v843_v63 = vld [vmem:[%s505_s20] sm:$0x1]  ;;  %v987_v24 = vld [vmem:[#allocation4] sm:$0xff]  ;;  %v988_v25 = vld [vmem:[#allocation4 + $0x8] sm:$0xff] }
  0xfc   : > { %1577 = vmatpush3.bf16.msra.mxu1 %v1729_v7  ;;  %1556 = vmatprep.subr.bf16.mxu0 %v1730_v8  ;;  %v1489_v1 = vld [vmem:[%s498_s6] ss:$0 sm:$0xff]  ;;  %v989_v27 = vld [vmem:[#allocation4 + $0x10] sm:$0xff] }
  0xfd   : > { %1578 = vmatprep.subr.bf16.mxu1 %v1731_v9  ;;  %v990_v30 = vld [vmem:[#allocation4 + $0x18] sm:$0xff] }
  0xff   : > { %1557 = vmatpush3.bf16.msra.mxu0 %v1732_v11 }
 0x100   : > { %1579 = vmatpush3.bf16.msra.mxu1 %v1733_v12  ;;  %1558 = vmatprep.subr.bf16.mxu0 %v1734_v13 }
 0x101   : > { %1580 = vmatprep.subr.bf16.mxu1 %v1735_v14 }
 0x103   : > { %1559 = vmatpush3.bf16.msra.mxu0 %v1736_v16 }
 0x104   : > { %1581 = vmatpush3.bf16.msra.mxu1 %v1737_v17  ;;  %1560 = vmatprep.subr.bf16.mxu0 %v1738_v18 }
 0x105   : > { %1582 = vmatprep.subr.bf16.mxu1 %v1739_v19 }
 0x107   : > { %1561 = vmatpush3.bf16.msra.mxu0 %v1740_v21 }
 0x108   : > { %1583 = vmatpush3.bf16.msra.mxu1 %v1741_v23  ;;  %1088 = vmatprep.subr.bf16.mxu0 %v1744_v40  ;;  %v1147_v40 = vld [vmem:[%s2391_s25] sm:$0x3] (!%p1538_p2) }
 0x109   : > { %v1152_v41 = vrot.slane (!%p1538_p2), %v1147_v40, %v2447_v20 }
 0x10a   : > { %788 = vmatmul.mubr.bf16.vlgmr.msra.gmra.mrb[0].mxu0 %v618_v45 }
 0x10b   : > { %973 = vmatmul.mubr.bf16.vlgmr.msra.gmra.mrb[0].mxu1 %v809_v38  ;;  %1089 = vmatpush1.bf16.msra.mxu0 %v1742_v44  ;;  %v1156_v44 = vrot.slane (!%p1538_p2), %v1147_v40, %v805_v22 }
 0x10c   : > { %1090 = vmatprep.subr.bf16.mxu0 %v1747_v46  ;;  %1120 = vmatprep.mubr.bf16.mxu0 %v2049_v57 }
 0x10f   : > { %1091 = vmatpush1.bf16.msra.mxu0 %v1745_v47 }
 0x110   : > { %1092 = vmatprep.subr.bf16.mxu0 %v1750_v48 }
 0x113   : > { %1093 = vmatpush1.bf16.msra.mxu0 %v1748_v49 }
 0x114   : > { %1094 = vmatprep.subr.bf16.mxu0 %v1753_v50 }
 0x117   : > { %1095 = vmatpush1.bf16.msra.mxu0 %v1751_v51 }
 0x118   : > { %1096 = vmatprep.subr.bf16.mxu0 %v1756_v52 }
 0x11b   : > { %1097 = vmatpush1.bf16.msra.mxu0 %v1754_v53 }
 0x11c   : > { %1098 = vmatprep.subr.bf16.mxu0 %v1759_v55 }
 0x11f   : > { %1099 = vmatpush1.bf16.msra.mxu0 %v1757_v54 }
 0x120   : > { %1100 = vmatprep.subr.bf16.mxu0 %v1762_v56 }
 0x123   : > { %1101 = vmatpush1.bf16.msra.mxu0 %v1760_v58 }
 0x124   : > { %1102 = vmatprep.subr.bf16.mxu0 %v1765_v59 }
 0x127   : > { %1103 = vmatpush1.bf16.msra.mxu0 %v1763_v60 }
 0x1dd   : > { %v1562_v62 = vpop.f32.mrb[0].mxu0 }
 0x1de   : > { %v1584_v61 = vpop.f32.mrb[0].mxu1  ;;  %v1563_v2 = vpop.f32.mrb[1].mxu0 }
 0x1df   : > { %v1585_v0 = vpop.f32.mrb[1].mxu1  ;;  %v1564_v5 = vadd.f32 %v1563_v2, %v1562_v62  ;;  %v1565_v6 = vpop.f32.mrb[2].mxu0 }
 0x1e0   : > { %v1586_v3 = vadd.f32 %v1585_v0, %v1584_v61  ;;  %v1587_v4 = vpop.f32.mrb[2].mxu1  ;;  %v1566_v9 = vpop.f32.mrb[3].mxu0 }
 0x1e1   : > { %v1588_v7 = vpop.f32.mrb[3].mxu1  ;;  %v790_v11 = vadd.f32 %v1564_v5, %v1489_v1  ;;  %v1567_v12 = vadd.f32 %v1566_v9, %v1565_v6 }
 0x1e2   : > { %v975_v8 = vadd.f32 %v1586_v3, %v843_v63 }
 0x1e3   : > { %v793_v13 = vadd.f32 %v1567_v12, %v1489_v1 }
 0x1e4   : > { %1766 = vtanh.f32 %v975_v8 }
 0x1e5   : > { %1768 = vtanh.f32 %v790_v11 }
 0x1e6   : > { %1770 = vtanh.f32 %v793_v13 }
 0x1ee   : > { %v1767_v14 = vpop.eup %1766 }
 0x1ef   : > { %v984_v16 = vrot.slane %v1767_v14, %v2447_v20  ;;  %v1769_v17 = vpop.eup %1768 }
 0x1f0   : > { %v1771_v18 = vpop.eup %1770 }
 0x1f1   : > { %v985_v19 = vmul.f32 %v1769_v17, %v984_v16  ;;  %v986_v21 = vmul.f32 %v1771_v18, %v984_v16 }
 0x1f3   : > { %v991_v23 = vpack.c.bf16 %v986_v21, %v985_v19 }
 0x1f5   : > { %1121 = vmatmul.mubr.bf16.vlgmr.msra.gmra.mrb[4].mxu0 %v991_v23 }
 0x2c8   : > { %v1122_v26 = vpop.f32.mrb[4].mxu0  ;;  %1142 = sbr.rel (%p1538_p2) target bundleno = 1088 (0x440), region = 84 }
 0x2c9   : > { %v1131_v28 = vadd.f32 %v1122_v26, %v987_v24  ;;  %v1124_v29 = vpop.f32.mrb[5].mxu0 }
 0x2ca   : > { %v1132_v31 = vadd.f32 %v1124_v29, %v988_v25  ;;  %v1126_v32 = vpop.f32.mrb[6].mxu0 }
 0x2cb   : > { %1135 = vst [vmem:[#allocation4] sm:$0xff] %v1131_v28  ;;  %v1133_v33 = vadd.f32 %v1126_v32, %v989_v27  ;;  %v1128_v34 = vpop.f32.mrb[7].mxu0 }
 0x2cc   : > { %1136 = vst [vmem:[#allocation4 + $0x8] sm:$0xff] %v1132_v31  ;;  %v1134_v35 = vadd.f32 %v1128_v34, %v990_v30 }
 0x2cd   : > { %1137 = vst [vmem:[#allocation4 + $0x10] sm:$0xff] %v1133_v33 }
 0x2ce   : > { %1138 = vst [vmem:[#allocation4 + $0x18] sm:$0xff] %v1134_v35 }
 0x2cf   : > { %s1193_s15 = scalar_select %p523_p6, 0.125, 0.0625 }
 0x2d0   : > { %vm1238_vm2 = vcmp.lt.s32.totalorder (!%p1539_p5), %v799_v10, 256 }
 0x2d1   : > { %v1212_v30 = vstv %s1193_s15 }
 0x2d2   : > { %v1143_v38 = vld [vmem:[#allocation4] sm:$0xff] }
 0x2d3   : > { %v1144_v39 = vld [vmem:[#allocation4 + $0x8] sm:$0xff]  ;;  %v1159_v47 = vadd.f32 %v1152_v41, %v1143_v38 }
 0x2d4   : > { %v1145_v45 = vld [vmem:[#allocation4 + $0x10] sm:$0xff]  ;;  %v1160_v48 = vadd.f32 %v1156_v44, %v1144_v39 }
 0x2d5   : > { %v1146_v46 = vld [vmem:[#allocation4 + $0x18] sm:$0xff]  ;;  %v1161_v49 = vadd.f32 %v1152_v41, %v1145_v45 }
 0x2d6   : > { %v1162_v50 = vadd.f32 %v1156_v44, %v1146_v46  ;;  %v1163_v51 = vmax.f32 %v1159_v47, %v1160_v48 }
 0x2d8   : > { %1164 = vmax.xlane.f32.xlu0 %v1163_v51  ;;  %v1166_v52 = vmax.f32 %v1161_v49, %v1162_v50 }
 0x2dc   : > { %1167 = vmax.xlane.f32.xlu0 %v1166_v52 }
 0x365   : > { %v1165_v53 = vpop.xlane.xlu0 %1164 }
 0x366   : > { %v1169_v54 = vsub.f32 %v1159_v47, %v1165_v53  ;;  %v1170_v55 = vsub.f32 %v1160_v48, %v1165_v53 }
 0x368   : > { %v1173_v56 = vmul.f32 1.442695, %v1169_v54  ;;  %v1175_v57 = vmul.f32 1.442695, %v1170_v55 }
 0x369   : > { %v1168_v58 = vpop.xlane.xlu0 %1167 }
 0x36a   : > { %1772 = vpow2.f32 %v1173_v56  ;;  %v1171_v20 = vsub.f32 %v1161_v49, %v1168_v58  ;;  %v1172_v59 = vsub.f32 %v1162_v50, %v1168_v58 }
 0x36b   : > { %1774 = vpow2.f32 %v1175_v57 }
 0x36c   : > { %v1177_v22 = vmul.f32 1.442695, %v1171_v20  ;;  %v1179_v60 = vmul.f32 1.442695, %v1172_v59 }
 0x36e   : > { %1776 = vpow2.f32 %v1177_v22 }
 0x36f   : > { %1778 = vpow2.f32 %v1179_v60 }
 0x374   : > { %v1773_v61 = vpop.eup %1772 }
 0x375   : > { %v1775_v62 = vpop.eup %1774 }
 0x376   : > { %v1181_v63 = vadd.f32 %v1775_v62, %v1773_v61 }
 0x378   : > { %v1777_v0 = vpop.eup %1776  ;;  %1182 = vadd.xlane.f32.xlu1 %v1181_v63 }
 0x379   : > { %v1779_v1 = vpop.eup %1778 }
 0x37a   : > { %v1184_v2 = vadd.f32 %v1779_v1, %v1777_v0 }
 0x37c   : > { %1185 = vadd.xlane.f32.xlu1 %v1184_v2 }
 0x405   : > { %v1183_v3 = vpop.xlane.xlu1 %1182 }
 0x406   : > { %1780 = vrcp.f32 %v1183_v3 }
 0x409   : > { %v1186_v4 = vpop.xlane.xlu1 %1185 }
 0x40a   : > { %1782 = vrcp.f32 %v1186_v4 }
 0x410   : > { %v1781_v5 = vpop.eup %1780 }
 0x411   : > { %v1189_v6 = vmul.f32 %v1781_v5, %v1773_v61  ;;  %v1190_v7 = vmul.f32 %v1781_v5, %v1775_v62 }
 0x413   : > { %v1194_v12 = vmul.f32 %v1189_v6, %v2464_v42  ;;  %v1195_v13 = vmul.f32 %v1190_v7, %v2457_v36 }
 0x414   : > { %v1783_v8 = vpop.eup %1782 }
 0x415   : > { %v1191_v9 = vmul.f32 %v1783_v8, %v1777_v0  ;;  %v1192_v11 = vmul.f32 %v1783_v8, %v1779_v1 }
 0x417   : > { %v1196_v14 = vmul.f32 %v1191_v9, %v2466_v43  ;;  %v1197_v16 = vmul.f32 %v1192_v11, %v2459_v37  ;;  %v2050_v37 = vmov (!%p1539_p5), 1966171168  }
 0x418   : > { %v1222_v33 = vunpack.c.l.s4 (!%p1539_p5), %v2050_v37 }
 0x419   : > { %v1198_v17 = vadd.f32 %v1196_v14, %v1194_v12  ;;  %v1205_v18 = vadd.f32 %v1197_v16, %v1195_v13 }
 0x41a   : > { %v1223_v35 = vunpack.c.0.s8 (!%p1539_p5), %v1222_v33 }
 0x41b   : > { %v1199_v19 = vrot.slane %v1198_v17, 4  ;;  %v1206_v21 = vrot.slane %v1205_v18, 4 }
 0x41c   : > { %v1226_v38 = vsub.s32 (!%p1539_p5), %v1223_v35, %v2440_v15 }
 0x41d   : > { %v1200_v23 = vadd.f32 %v1199_v19, %v1198_v17  ;;  %v1207_v24 = vadd.f32 %v1206_v21, %v1205_v18 }
 0x41f   : > { %v1201_v25 = vrot.slane %v1200_v23, 2  ;;  %v1208_v26 = vrot.slane %v1207_v24, 2 }
 0x421   : > { %v1202_v27 = vadd.f32 %v1201_v25, %v1200_v23  ;;  %v1209_v28 = vadd.f32 %v1208_v26, %v1207_v24  ;;  %1217 = sbr.rel (%p1539_p5) target bundleno = 1072 (0x430), region = 88 }
 0x423   : > { %v1203_v29 = vrot.slane %v1202_v27, 1  ;;  %v1210_v42 = vrot.slane %v1209_v28, 1 }
 0x425   : > { %v1204_v36 = vadd.f32 %v1203_v29, %v1202_v27  ;;  %v1211_v31 = vadd.f32 %v1210_v42, %v1209_v28 }
 0x427   : > { %v1213_v43 = vmul.f32 %v1212_v30, %v1204_v36  ;;  %v1214_v32 = vmul.f32 %v1212_v30, %v1211_v31 }
 0x429   : > { %v1220_v34 = vcombine.low %v1213_v43, %v1214_v32 }
 0x42b   : > { %v1227_v39 = vrot.slane %v1220_v34, %v1226_v38 }
 0x42d   : > { %v1234_v40 = vrot.slane %v1227_v39, %v1226_v38 }
 0x42f   : > { %1240 = vst.msk [vmem:[#allocation3] sm:$0x3] %vm1238_vm2, %v1234_v40 }
 0x430 PF: > { %1244 = sbr.rel (%p523_p6) target bundleno = 1088 (0x440), region = 92  ;;  %v2051_v41 = vmov (!%p523_p6), 1966171168   ;;  %v1249_v45 = vcombine.low (!%p523_p6), %v1213_v43, %v1214_v32  ;;  %v1245_v51 = vld [vmem:[#allocation2] sm:$0x3] (!%p523_p6)  ;;  %vm1269_vm3 = vcmp.lt.s32.totalorder (!%p523_p6), %v799_v10, 256 }
 0x431   : > { %v1251_v44 = vunpack.c.l.s4 (!%p523_p6), %v2051_v41 }
 0x433   : > { %v1252_v46 = vunpack.c.0.s8 (!%p523_p6), %v1251_v44 }
 0x435   : > { %v1255_v47 = vsub.s32 (!%p523_p6), %v1252_v46, %v2440_v15 }
 0x436   : > { %v1246_v49 = vld [vmem:[#allocation3] sm:$0x3] (!%p523_p6) }
 0x437   : > { %v1256_v48 = vrot.slane %v1249_v45, %v1255_v47 }
 0x439   : > { %v1263_v50 = vrot.slane %v1256_v48, %v1255_v47 }
 0x43b   : > { %v1265_v52 = vmul.f32 %v1263_v50, %v1246_v49 }
 0x43d   : > { %v1266_v53 = vadd.f32 %v1265_v52, %v1245_v51 }
 0x43f   : > { %1271 = vst.msk [vmem:[#allocation2] sm:$0x3] %vm1269_vm3, %v1266_v53 }
 0x440 PF: > { %p1272_p7 = scmp.eq.s32.totalorder %s2022_s9, 3 }
 0x442   : > { %p1273_p11 = pnand %p1272_p7, %p1139_p12 }
 0x443   : > { %vm1280_vm4 = vcmp.lt.s32.totalorder (!%p1273_p11), %v799_v10, 256 }
 0x444   : > { %1276 = sbr.rel (%p1273_p11) target bundleno = 1099 (0x44b), region = 96 }
 0x446   : > { %v1277_v54 = vld [vmem:[#allocation2] sm:$0x3] (!%p1273_p11) }
 0x447   : > { %1282 = vst.msk [vmem:[#allocation13] sm:$0x3] (!%p1273_p11), %vm1280_vm4, %v1277_v54 }
 0x44b PF: > { %p1630_p0 = scmp.eq.s32.totalorder %s2137_s13, 7  ;;  %s2052_s25 = smov [#allocation13]  }
 0x44c   : > { %s1290_s18 = sshll.u32 %s2052_s25, 4  ;;  %s1291_s18 = int_to_ptr.vmem [resolvable:$true] %s1290_s18 }
 0x44d   : > { %s1930_s22 = scalar_lea.vmem %s1291_s18, 32  ;;  %p1937_p13 = scmp.lt.s32.totalorder %s1291_s18, %s1291_s18 }
 0x44e   : > { %p1931_p9 = scmp.ne.s32.totalorder %s1291_s18, %s1930_s22  ;;  %p1938_p3 = scmp.lt.s32.totalorder %s1930_s22, %s1930_s22 }
 0x450   : > { %p1932_p10 = pnand %p1931_p9, %p1630_p0  ;;  %p1939_p8 = por %p1938_p3, %p1937_p13 }
 0x452   : > { %p1933_p4 = pneg %p1932_p10 }
 0x454   : > { %p1940_p6 = pnand %p1939_p8, %p1933_p4 }
 0x456   : > { %1943 = shalt.err (!%p1940_p6)
}
 0x457   : > { %s2632_s17 = sld [smem:[#allocation28_spill]] }
 0x45d   : > { %s1944_s6 = scalar_lea.hbm %s2632_s17, 32 }
 0x45e   : > { %p1945_p1 = scmp.ne.s32.totalorder %s2632_s17, %s1944_s6  ;;  %p1950_p5 = scmp.lt.u32.totalorder %s1944_s6, %s2632_s17 }
 0x460   : > { %p1946_p12 = pnand %p1945_p1, %p1630_p0 }
 0x462   : > { %p1947_p2 = pneg %p1946_p12 }
 0x464   : > { %p1952_p7 = pnand %p1950_p5, %p1947_p2 }
 0x466   : > { %1955 = shalt.err (!%p1952_p7)
}
 0x467   : > { %1605 = dma.vmem_to_hbm [thread:$0]  (%p1630_p0), %s1291_s18, 32, %s2632_s17, [#allocation7]  }
 0x468   : > { %2001 = dma.done.wait (%p1630_p0), [#allocation7], 32  }
 0x469   : > { %2003 = vsyncadd (%p1630_p0), [#allocation7], 4294967264 }
 0x46a PF: > { %s2633_s21 = sld [smem:[#allocation19_spill]]  ;;  %s2634_s19 = sld [smem:[#allocation18_spill]] }
 0x46b   : > { %s2635_s29 = sld [smem:[#allocation22_spill]]  ;;  %s2636_s14 = sld [smem:[#allocation20_spill]] }
 0x46c   : > { %s2637_s7 = sld [smem:[#allocation21_spill]]  ;;  %s2638_s27 = smov %s2010_s28 }
 0x46d   : > { %s2640_s30 = smov %s2026_s10  ;;  %s2641_s9 = smov %s2030_s11 }
 0x470   : > { %s21_s12 = sadd.s32 1, %s2633_s21   ;;  %s2639_s28 = smov %s2634_s19 }
 0x471   : > { %p18_p11 = scmp.ge.s32.totalorder %s21_s12, 10   ;;  %s2642_s10 = smov %s2636_s14 }
 0x472   : > { %s2643_s11 = smov %s2637_s7 }
 0x473   :  { %20 = sbr.rel (!%p18_p11) target bundleno = 13 (0xd), region = 151 }
 0x47a   :  { %1303 = vsyncpa [#allocation6], 1 }
 0x47b   :  { %1305 = vsyncpa [#allocation6 + $0x1], 1 }
 0x47c   :  { %1306 = vsyncpa [#allocation9], 1 }
 0x47d   :  { %1307 = vsyncpa [#allocation7], 1 }
 0x47e   :  { %1309 = vsyncpa [#allocation7 + $0x1], 1 }

</bundles_post_ra>
